<compile_context>
chip_gen: v7x
topology: tpu7x:2x2x1
jax: 0.10.0
libtpu: 0.0.40
codegen_flags: <defaults>
</compile_context>

<pallas_src>
import functools

import jax
import jax.numpy as jnp
from jax.experimental import pallas as pl
from jax.experimental.pallas import tpu as pltpu

GAMMA = 0.1          # AntiSymmetricConv default
EPS = 0.1            # AntiSymmetricConv default
_LANE = 128


def _round_up(x, m):
    return (x + m - 1) // m * m


def _pick_vmem_limit():
    """Generation-aware scoped-VMEM budget (<=48 MiB on v7x, larger on v5e/v6e)."""
    cap = 64 * 1024 * 1024
    try:
        cap = int(pltpu.get_tpu_info().vmem_capacity_bytes)
    except Exception:
        pass
    return int(min(max(cap - 16 * 1024 * 1024, 32 * 1024 * 1024), 112 * 1024 * 1024))


_VMEM_LIMIT = _pick_vmem_limit()


# --------------------------------------------------------------------------- #
# Kernel 0: per-layer node projection (hoisted out of the reduction grid)
#   H0  = x @ (W - W^T - gamma*I)^T + b     (kept in f32)
#   XWg = x @ Wg^T                          (compute dtype, fed to the A matmul)
# --------------------------------------------------------------------------- #
def projection_kernel(x_ref, mt_ref, wgt_ref, b_ref, h0_ref, xwg_ref):
    f32 = jnp.float32
    h0_ref[...] = (
        jnp.dot(x_ref[...], mt_ref[...], preferred_element_type=f32) + b_ref[...])
    xwg_ref[...] = jnp.dot(
        x_ref[...], wgt_ref[...], preferred_element_type=f32).astype(xwg_ref.dtype)


def _projection_call(x_p, mt, wgt, b_p, *, tn, compute_dtype):
    n_pad, c_pad = x_p.shape
    return pl.pallas_call(
        projection_kernel,
        out_shape=(jax.ShapeDtypeStruct((n_pad, c_pad), jnp.float32),
                   jax.ShapeDtypeStruct((n_pad, c_pad), compute_dtype)),
        grid_spec=pltpu.PrefetchScalarGridSpec(
            num_scalar_prefetch=0,
            grid=(n_pad // tn,),
            in_specs=[
                pl.BlockSpec((tn, c_pad), lambda i: (i, 0)),        # x rows
                pl.BlockSpec((c_pad, c_pad), lambda i: (0, 0)),     # (W-W^T-gI)^T
                pl.BlockSpec((c_pad, c_pad), lambda i: (0, 0)),     # Wg^T
                pl.BlockSpec((1, c_pad), lambda i: (0, 0)),         # bias (f32)
            ],
            out_specs=[pl.BlockSpec((tn, c_pad), lambda i: (i, 0)),
                       pl.BlockSpec((tn, c_pad), lambda i: (i, 0))],
        ),
        compiler_params=pltpu.CompilerParams(
            dimension_semantics=("parallel",),
            vmem_limit_bytes=_VMEM_LIMIT,
        ),
    )(x_p, mt, wgt, b_p)


# --------------------------------------------------------------------------- #
# Kernel 1: AntiSymmetricConv layer = A_norm contraction + residual/tanh update.
# Grid = (row tiles "parallel", N-reduction tiles "arbitrary").
# Layer 2 optionally fuses the classifier projections P = x2 @ Wc_row^T,
# Q = x2 @ Wc_col^T into the finalize step (computed from the f32 y tile).
# --------------------------------------------------------------------------- #
def asym_layer_kernel(*refs, apply_relu, fuse_pq):
    if fuse_pq:
        (x_ref, h0_ref, a_ref, xwg_ref, wcr_ref, wcc_ref,
         out_ref, p_ref, q_ref, acc_ref) = refs
    else:
        x_ref, h0_ref, a_ref, xwg_ref, out_ref, acc_ref = refs

    f32 = jnp.float32
    k = pl.program_id(1)

    @pl.when(k == 0)
    def _init():
        acc_ref[...] = h0_ref[...]                      # x @ M^T + b (precomputed, f32)

    # GCN message term: A[i, k] @ XWg[k], accumulated over k in f32 on the MXU.
    acc_ref[...] += jnp.dot(a_ref[...], xwg_ref[...], preferred_element_type=f32)

    @pl.when(k == pl.num_programs(1) - 1)
    def _finalize():
        y = x_ref[...].astype(f32) + EPS * jnp.tanh(acc_ref[...])
        if apply_relu:                                  # F.relu between conv1 and conv2
            y = jnp.maximum(y, 0.0)
        out_ref[...] = y.astype(out_ref.dtype)
        if fuse_pq:                                     # classifier halves, from f32 y
            p_ref[...] = jnp.dot(y, wcr_ref[...], preferred_element_type=f32)
            q_ref[...] = jnp.dot(y, wcc_ref[...], preferred_element_type=f32)


def _asym_layer_call(x_p, h0, xwg, a_p, *, tn, tk, apply_relu, wcr=None, wcc=None):
    fuse_pq = wcr is not None
    n_pad, c_pad = x_p.shape
    grid = (n_pad // tn, n_pad // tk)

    in_specs = [
        pl.BlockSpec((tn, c_pad), lambda i, k: (i, 0)),   # x rows (residual)
        pl.BlockSpec((tn, c_pad), lambda i, k: (i, 0)),   # H0 rows (f32)
        pl.BlockSpec((tn, tk), lambda i, k: (i, k)),      # A_norm tile
        pl.BlockSpec((tk, c_pad), lambda i, k: (k, 0)),   # XWg reduction tile
    ]
    operands = [x_p, h0, a_p, xwg]
    out_shape = jax.ShapeDtypeStruct((n_pad, c_pad), x_p.dtype)
    out_specs = pl.BlockSpec((tn, c_pad), lambda i, k: (i, 0))

    if fuse_pq:
        out_pad = wcr.shape[1]
        in_specs += [pl.BlockSpec((c_pad, out_pad), lambda i, k: (0, 0)),  # Wc_row^T
                     pl.BlockSpec((c_pad, out_pad), lambda i, k: (0, 0))]  # Wc_col^T
        operands += [wcr, wcc]
        out_shape = (out_shape,
                     jax.ShapeDtypeStruct((n_pad, out_pad), jnp.float32),
                     jax.ShapeDtypeStruct((n_pad, out_pad), jnp.float32))
        out_specs = [out_specs,
                     pl.BlockSpec((tn, out_pad), lambda i, k: (i, 0)),
                     pl.BlockSpec((tn, out_pad), lambda i, k: (i, 0))]

    return pl.pallas_call(
        functools.partial(asym_layer_kernel, apply_relu=apply_relu, fuse_pq=fuse_pq),
        out_shape=out_shape,
        grid_spec=pltpu.PrefetchScalarGridSpec(
            num_scalar_prefetch=0,
            grid=grid,
            in_specs=in_specs,
            out_specs=out_specs,
            scratch_shapes=[pltpu.VMEM((tn, c_pad), jnp.float32)],
        ),
        compiler_params=pltpu.CompilerParams(
            dimension_semantics=("parallel", "arbitrary"),
            vmem_limit_bytes=_VMEM_LIMIT,
        ),
    )(*operands)


# --------------------------------------------------------------------------- #
# Kernel 2: edge classifier = gather + add.  out[e] = P[row[e]] + Q[col[e]] + bc.
# row/col indices are scalar-prefetched into SMEM; the gather is an unrolled
# per-edge dynamic-row copy from the resident (n_pad, out_pad) P/Q tables.
# --------------------------------------------------------------------------- #
def edge_classifier_kernel(row_ref, col_ref, p_ref, q_ref, bc_ref, out_ref):
    te = out_ref.shape[0]
    base = pl.program_id(0) * te
    bias = bc_ref[...]                                   # (1, out_pad), loaded once

    def gather_one(j, carry):
        r = row_ref[base + j]                            # SMEM scalar reads
        c = col_ref[base + j]
        out_ref[pl.ds(j, 1), :] = p_ref[pl.ds(r, 1), :] + q_ref[pl.ds(c, 1), :] + bias
        return carry

    jax.lax.fori_loop(0, te, gather_one, 0, unroll=True)


def _edge_classifier_call(row_p, col_p, p_nodes, q_nodes, bc_p, *, te):
    e_pad = row_p.shape[0]
    n_pad, out_pad = p_nodes.shape
    return pl.pallas_call(
        edge_classifier_kernel,
        out_shape=jax.ShapeDtypeStruct((e_pad, out_pad), jnp.float32),
        grid_spec=pltpu.PrefetchScalarGridSpec(
            num_scalar_prefetch=2,                       # row / col indices -> SMEM
            grid=(e_pad // te,),
            in_specs=[
                pl.BlockSpec((n_pad, out_pad), lambda e, row, col: (0, 0)),   # P
                pl.BlockSpec((n_pad, out_pad), lambda e, row, col: (0, 0)),   # Q
                pl.BlockSpec((1, out_pad), lambda e, row, col: (0, 0)),       # bc
            ],
            out_specs=pl.BlockSpec((te, out_pad), lambda e, row, col: (e, 0)),
        ),
        compiler_params=pltpu.CompilerParams(
            dimension_semantics=("parallel",),
            vmem_limit_bytes=_VMEM_LIMIT,
        ),
    )(row_p, col_p, p_nodes, q_nodes, bc_p)


# --------------------------------------------------------------------------- #
# Host-side prep + wrapper
# --------------------------------------------------------------------------- #
def _gcn_normalized_dense_adj(edge_index, num_nodes):
    """Dense GCN-normalized adjacency (gcn_norm with add_self_loops=True).

    Assumes `edge_index` contains no self loops (true for the synthetic input
    below), matching PyG's behaviour of adding one self loop per node."""
    row, col = edge_index[0], edge_index[1]
    loop = jnp.arange(num_nodes, dtype=row.dtype)
    row = jnp.concatenate([row, loop])
    col = jnp.concatenate([col, loop])
    w = jnp.ones(row.shape[0], jnp.float32)
    deg = jnp.zeros((num_nodes,), jnp.float32).at[col].add(w)
    dis = jnp.where(deg > 0, jax.lax.rsqrt(deg), 0.0)
    norm = dis[row] * w * dis[col]
    # out_i = sum_j A[i, j] * x_j   (message from source=row to target=col)
    return jnp.zeros((num_nodes, num_nodes), jnp.float32).at[col, row].add(norm)


def _node_tiling(N):
    """Node padding / tile sizes.  >=128-aligned, tiles up to 512 for big graphs
    (the layer kernel is HBM-bound on streaming A_norm; bigger tiles -> better
    pipeline efficiency and less re-streaming of the XWg reduction operand)."""
    if N <= 128:
        n_pad = 128
    elif N <= 256:
        n_pad = 256
    else:
        n_pad = _round_up(N, 256)
    if n_pad >= 1024 and n_pad % 512 == 0:
        t = 512
    else:
        t = min(n_pad, 256)
    return n_pad, t, t


def edge_classifier_forward(x, edge_index, params, compute_dtype=jnp.float32):
    """Full forward pass.  compute_dtype=bf16 uses bf16 MXU inputs with f32
    accumulation (recommended on v5e/v6e/v7x: halves the dominant A_norm HBM
    stream); compute_dtype=f32 is the bit-accurate path."""
    N, C = x.shape
    E = edge_index.shape[1]
    W1, Wg1, b1, W2, Wg2, b2, Wc, bc = params
    OUT = Wc.shape[0]

    c_pad = _round_up(C, _LANE)          # do NOT pad beyond 128: HBM-bound on A
    out_pad = _round_up(OUT, _LANE)

    n_pad, tn, tk = _node_tiling(N)
    te = 128 if E > 128 else _round_up(E, 8)
    e_pad = _round_up(E, te)

    a = _gcn_normalized_dense_adj(edge_index, N)

    eye = jnp.eye(C, dtype=jnp.float32)
    m1t = (W1 - W1.T - GAMMA * eye).T          # projection kernel computes x @ M^T
    m2t = (W2 - W2.T - GAMMA * eye).T

    pad2 = lambda m, r, c: jnp.pad(m, ((0, r - m.shape[0]), (0, c - m.shape[1])))

    x_p = pad2(x, n_pad, c_pad).astype(compute_dtype)
    a_p = pad2(a, n_pad, n_pad).astype(compute_dtype)
    m1t_p = pad2(m1t, c_pad, c_pad).astype(compute_dtype)
    m2t_p = pad2(m2t, c_pad, c_pad).astype(compute_dtype)
    wg1t_p = pad2(Wg1.T, c_pad, c_pad).astype(compute_dtype)
    wg2t_p = pad2(Wg2.T, c_pad, c_pad).astype(compute_dtype)
    b1_p = pad2(b1.reshape(1, C), 1, c_pad)            # biases stay f32
    b2_p = pad2(b2.reshape(1, C), 1, c_pad)

    # Classifier halves (f32, tiny): concat([x2[row], x2[col]]) @ Wc^T + bc
    #   == (x2 @ Wc[:, :C]^T)[row] + (x2 @ Wc[:, C:]^T)[col] + bc
    wcr_p = pad2(Wc[:, :C].T, c_pad, out_pad)
    wcc_p = pad2(Wc[:, C:].T, c_pad, out_pad)
    bc_p = pad2(bc.reshape(1, OUT), 1, out_pad)

    row_p = jnp.pad(edge_index[0].astype(jnp.int32), (0, e_pad - E))
    col_p = jnp.pad(edge_index[1].astype(jnp.int32), (0, e_pad - E))

    # Layer 1: projection (hoisted) then A contraction + relu.
    h0_1, xwg1 = _projection_call(x_p, m1t_p, wg1t_p, b1_p,
                                  tn=tn, compute_dtype=compute_dtype)
    x1 = _asym_layer_call(x_p, h0_1, xwg1, a_p, tn=tn, tk=tk, apply_relu=True)

    # Layer 2: projection, A contraction, classifier P/Q fused into finalize.
    h0_2, xwg2 = _projection_call(x1, m2t_p, wg2t_p, b2_p,
                                  tn=tn, compute_dtype=compute_dtype)
    _, p_nodes, q_nodes = _asym_layer_call(x1, h0_2, xwg2, a_p, tn=tn, tk=tk,
                                           apply_relu=False, wcr=wcr_p, wcc=wcc_p)

    # Edge classifier: gather + add only (no per-edge matmul).
    out = _edge_classifier_call(row_p, col_p, p_nodes, q_nodes, bc_p, te=te)
    # Padded edge rows (E..e_pad) gather node 0 and are junk — must slice here.
    return out[:E, :OUT]


def reference_forward(x, edge_index, params):
    """Pure-JAX reference mirroring the PyTorch forward exactly."""
    W1, Wg1, b1, W2, Wg2, b2, Wc, bc = params
    C = x.shape[1]
    a = _gcn_normalized_dense_adj(edge_index, x.shape[0])

    def layer(xin, W, Wg, b):
        M = W - W.T - GAMMA * jnp.eye(C, dtype=jnp.float32)
        h = xin @ M.T + a @ (xin @ Wg.T) + b
        return xin + EPS * jnp.tanh(h)

    x1 = jax.nn.relu(layer(x, W1, Wg1, b1))
    x2 = layer(x1, W2, Wg2, b2)
    row, col = edge_index[0], edge_index[1]
    emb = jnp.concatenate([x2[row], x2[col]], axis=-1)
    return emb @ Wc.T + bc


if __name__ == "__main__":
    N = 200           # nodes (pads to 256 -> single 256 node tile)
    C = 16            # in_channels
    OUT = 8           # out_channels
    E = 256           # edges (2 edge tiles of 128)

    key = jax.random.PRNGKey(0)
    ks = jax.random.split(key, 10)

    x = jax.random.normal(ks[0], (N, C), jnp.float32)

    # deterministic self-loop-free edge_index [2, E]
    row = jax.random.randint(ks[1], (E,), 0, N, dtype=jnp.int32)
    off = jax.random.randint(ks[2], (E,), 1, N, dtype=jnp.int32)
    col = (row + off) % N
    edge_index = jnp.stack([row, col], axis=0)

    # deterministic parameters (synthetic init, module __init__ shapes)
    W1 = jax.random.normal(ks[3], (C, C), jnp.float32) * 0.3      # AntiSymmetricConv.W
    Wg1 = jax.random.normal(ks[4], (C, C), jnp.float32) * 0.3     # GCNConv lin weight
    b1 = jax.random.normal(ks[5], (C,), jnp.float32) * 0.1
    W2 = jax.random.normal(ks[6], (C, C), jnp.float32) * 0.3
    Wg2 = jax.random.normal(ks[7], (C, C), jnp.float32) * 0.3
    b2 = jax.random.normal(ks[8], (C,), jnp.float32) * 0.1
    Wc = jax.random.normal(ks[9], (OUT, 2 * C), jnp.float32) * 0.3
    bc = jnp.linspace(-0.1, 0.1, OUT, dtype=jnp.float32)
    params = (W1, Wg1, b1, W2, Wg2, b2, Wc, bc)

    ref = jax.block_until_ready(reference_forward(x, edge_index, params))

    # f32 path: tight check against the pure-JAX reference.
    out_f32 = jax.block_until_ready(
        edge_classifier_forward(x, edge_index, params, compute_dtype=jnp.float32))
    assert out_f32.shape == (E, OUT)
    err32 = float(jnp.max(jnp.abs(out_f32 - ref)))
    assert jnp.allclose(out_f32, ref, atol=1e-3, rtol=1e-3), err32

    # bf16 MXU path (recommended on v5e/v6e/v7x): loose tolerance for bf16 rounding.
    out_bf16 = jax.block_until_ready(
        edge_classifier_forward(x, edge_index, params, compute_dtype=jnp.bfloat16))
    errbf = float(jnp.max(jnp.abs(out_bf16 - ref)))
    assert jnp.allclose(out_bf16, ref, atol=2e-1, rtol=1e-1), errbf

    print("KERNEL_OK")
</pallas_src>

<mosaic_0001>
module attributes {stable_mosaic.version = 11 : i64} {
  func.func @projection_kernel(%arg0: i32, %arg1: memref<256x128xf32, #tpu.memory_space<vmem>>, %arg2: memref<128x128xf32, #tpu.memory_space<vmem>>, %arg3: memref<128x128xf32, #tpu.memory_space<vmem>>, %arg4: memref<1x128xf32, #tpu.memory_space<vmem>>, %arg5: memref<256x128xf32, #tpu.memory_space<vmem>>, %arg6: memref<256x128xf32, #tpu.memory_space<vmem>>) attributes {dimension_semantics = [#tpu.dimension_semantics<parallel>], iteration_bounds = array<i64: 1>, scalar_prefetch = 0 : i64, scratch_operands = 0 : i64, tpu.core_type = #tpu.core_type<tc>, window_params = [{transform_indices = @transform_0, window_bounds = array<i64: 256, 128>}, {pipeline_mode = #tpu.pipeline_mode<synchronous>, transform_indices = @transform_1, window_bounds = array<i64: 128, 128>}, {pipeline_mode = #tpu.pipeline_mode<synchronous>, transform_indices = @transform_2, window_bounds = array<i64: 128, 128>}, {pipeline_mode = #tpu.pipeline_mode<synchronous>, transform_indices = @transform_3, window_bounds = array<i64: 1, 128>}, {transform_indices = @transform_4, window_bounds = array<i64: 256, 128>}, {transform_indices = @transform_5, window_bounds = array<i64: 256, 128>}]} {
    %c0 = arith.constant 0 : index
    %c0_0 = arith.constant 0 : index
    %0 = vector.load %arg1[%c0, %c0_0] : memref<256x128xf32, #tpu.memory_space<vmem>>, vector<256x128xf32>
    %c0_1 = arith.constant 0 : index
    %c0_2 = arith.constant 0 : index
    %1 = vector.load %arg2[%c0_1, %c0_2] : memref<128x128xf32, #tpu.memory_space<vmem>>, vector<128x128xf32>
    %cst = arith.constant dense<0.000000e+00> : vector<256x128xf32>
    %2 = tpu.matmul %0, %1, %cst {dimension_numbers = #tpu.dot_dimension_numbers<[1], [0], [0], [1], [0, 0, 1, 1], [], []>} : vector<256x128xf32>, vector<128x128xf32>, vector<256x128xf32> -> vector<256x128xf32>
    %c0_3 = arith.constant 0 : index
    %c0_4 = arith.constant 0 : index
    %3 = vector.load %arg4[%c0_3, %c0_4] : memref<1x128xf32, #tpu.memory_space<vmem>>, vector<1x128xf32>
    %4 = vector.broadcast %3 : vector<1x128xf32> to vector<256x128xf32>
    %5 = arith.addf %2, %4 : vector<256x128xf32>
    %c0_5 = arith.constant 0 : index
    %c0_6 = arith.constant 0 : index
    %6 = vector.load %arg5[%c0_5, %c0_6] : memref<256x128xf32, #tpu.memory_space<vmem>>, vector<256x128xf32>
    tpu.vector_store %arg5[%c0_5, %c0_6], %5 {strides = array<i32>} : memref<256x128xf32, #tpu.memory_space<vmem>>, vector<256x128xf32>,
    %c0_7 = arith.constant 0 : index
    %c0_8 = arith.constant 0 : index
    %7 = vector.load %arg1[%c0_7, %c0_8] : memref<256x128xf32, #tpu.memory_space<vmem>>, vector<256x128xf32>
    %c0_9 = arith.constant 0 : index
    %c0_10 = arith.constant 0 : index
    %8 = vector.load %arg3[%c0_9, %c0_10] : memref<128x128xf32, #tpu.memory_space<vmem>>, vector<128x128xf32>
    %cst_11 = arith.constant dense<0.000000e+00> : vector<256x128xf32>
    %9 = tpu.matmul %7, %8, %cst_11 {dimension_numbers = #tpu.dot_dimension_numbers<[1], [0], [0], [1], [0, 0, 1, 1], [], []>} : vector<256x128xf32>, vector<128x128xf32>, vector<256x128xf32> -> vector<256x128xf32>
    %c0_12 = arith.constant 0 : index
    %c0_13 = arith.constant 0 : index
    %10 = vector.load %arg6[%c0_12, %c0_13] : memref<256x128xf32, #tpu.memory_space<vmem>>, vector<256x128xf32>
    tpu.vector_store %arg6[%c0_12, %c0_13], %9 {strides = array<i32>} : memref<256x128xf32, #tpu.memory_space<vmem>>, vector<256x128xf32>,
    return
  }
  func.func @transform_0(%arg0: i32) -> (i32, i32) {
    %c0_i32 = arith.constant 0 : i32
    %c0_i32_0 = arith.constant 0 : i32
    return %arg0, %c0_i32 : i32, i32
  }
  func.func @transform_1(%arg0: i32) -> (i32, i32) {
    %c0_i32 = arith.constant 0 : i32
    %c0_i32_0 = arith.constant 0 : i32
    %c0_i32_1 = arith.constant 0 : i32
    return %c0_i32, %c0_i32_0 : i32, i32
  }
  func.func @transform_2(%arg0: i32) -> (i32, i32) {
    %c0_i32 = arith.constant 0 : i32
    %c0_i32_0 = arith.constant 0 : i32
    %c0_i32_1 = arith.constant 0 : i32
    return %c0_i32, %c0_i32_0 : i32, i32
  }
  func.func @transform_3(%arg0: i32) -> (i32, i32) {
    %c0_i32 = arith.constant 0 : i32
    %c0_i32_0 = arith.constant 0 : i32
    %c0_i32_1 = arith.constant 0 : i32
    return %c0_i32, %c0_i32_0 : i32, i32
  }
  func.func @transform_4(%arg0: i32) -> (i32, i32) {
    %c0_i32 = arith.constant 0 : i32
    %c0_i32_0 = arith.constant 0 : i32
    return %arg0, %c0_i32 : i32, i32
  }
  func.func @transform_5(%arg0: i32) -> (i32, i32) {
    %c0_i32 = arith.constant 0 : i32
    %c0_i32_0 = arith.constant 0 : i32
    return %arg0, %c0_i32 : i32, i32
  }
}

</mosaic_0001>

<bundles_post_ra>
// kernel: tpu_custom_call.1
= control target key start
LH: loop header
LB: loop body
LE: loop exit
PB: predicated region body
PF: predicated region fallthrough
CT: control target
= control target key end

     0   :  { %11 = vsyncpa [#allocation3], 0  ;;  %s1322_s0 = inlined_call_operand.hbm [shape: f32[256,128], index: 0, kind: input, shape index: {}]   ;;  %s1323_s1 = inlined_call_operand.hbm [shape: f32[128,128], index: 1, kind: input, shape index: {}]   ;;  %s1324_s2 = inlined_call_operand.hbm [shape: f32[128,128], index: 2, kind: input, shape index: {}]   ;;  %s1325_s3 = inlined_call_operand.vmem [shape: f32[1,128], index: 3, kind: input, shape index: {}]   ;;  %s1326_s4 = inlined_call_operand.hbm [shape: f32[256,128], index: 4, kind: output, shape index: {0}]   ;;  %s1327_s5 = inlined_call_operand.hbm [shape: f32[256,128], index: 5, kind: output, shape index: {1}]  }
   0x1   :  { %12 = vsyncpa [#allocation6], 0 }
   0x2   :  { %13 = vsyncpa [#allocation4], 0 }
   0x3   :  { %14 = vsyncpa [#allocation10], 0  ;;  %s1159_s18 = smov [#allocation5]   ;;  %s1160_s20 = smov [#allocation2]  }
   0x4   :  { %s32_s19 = sshll.u32 %s1159_s18, 4  ;;  %s20_s21 = sshll.u32 %s1160_s20, 4  ;;  %s33_s19 = int_to_ptr.vmem [resolvable:$true] %s32_s19  ;;  %s1196_s21 = int_to_ptr.vmem [resolvable:$true] %s20_s21 }
   0x5   :  { %s1041_s24 = scalar_lea.hbm %s1323_s1, 2048 }
   0x6   :  { %p1042_p0 = scmp.ne.s32.totalorder %s1323_s1, %s1041_s24  ;;  %p1045_p1 = scmp.lt.u32.totalorder %s1041_s24, %s1323_s1 }
   0x8   :  { %p1047_p2 = pnand %p1045_p1, %p1042_p0 }
   0xa   :  { %1050 = shalt.err (!%p1047_p2)
}
   0xb   :  { %s1051_s29 = scalar_lea.vmem %s33_s19, 2048  ;;  %p1056_p4 = scmp.lt.s32.totalorder %s33_s19, %s33_s19 }
   0xc   :  { %p1052_p3 = scmp.ne.s32.totalorder %s33_s19, %s1051_s29  ;;  %p1057_p5 = scmp.lt.s32.totalorder %s1051_s29, %s1051_s29 }
   0xe   :  { %p1058_p6 = por %p1057_p5, %p1056_p4 }
  0x10   :  { %p1059_p7 = pnand %p1058_p6, %p1052_p3 }
  0x12   :  { %1062 = shalt.err (!%p1059_p7)
}
  0x13   :  { %s1161_s30 = smov 128   ;;  %s1162_s6 = smov 8  }
  0x14   :  { %38 = dma.hbm_to_vmem [thread:$0]  %s1323_s1, 2048, %s33_s19, [#allocation6], %s1161_s30, %s1161_s30, %s1162_s6  }
  0x15   :  { %s1063_s11 = scalar_lea.hbm %s1322_s0, 4096 }
  0x16   :  { %p1064_p8 = scmp.ne.s32.totalorder %s1322_s0, %s1063_s11  ;;  %p1067_p9 = scmp.lt.u32.totalorder %s1063_s11, %s1322_s0 }
  0x18   :  { %p1069_p10 = pnand %p1067_p9, %p1064_p8 }
  0x1a   :  { %1072 = shalt.err (!%p1069_p10)
}
  0x1b   :  { %s1073_s16 = scalar_lea.vmem %s1196_s21, 4096  ;;  %p1078_p12 = scmp.lt.s32.totalorder %s1196_s21, %s1196_s21 }
  0x1c   :  { %p1074_p11 = scmp.ne.s32.totalorder %s1196_s21, %s1073_s16  ;;  %p1079_p13 = scmp.lt.s32.totalorder %s1073_s16, %s1073_s16 }
  0x1e   :  { %p1080_p0 = por %p1079_p13, %p1078_p12 }
  0x20   :  { %p1081_p1 = pnand %p1080_p0, %p1074_p11 }
  0x22   :  { %1084 = shalt.err (!%p1081_p1)
}
  0x23   :  { %26 = dma.hbm_to_vmem [thread:$0]  %s1322_s0, 4096, %s1196_s21, [#allocation3], %s1161_s30, %s1161_s30, %s1162_s6  }
  0x24   :  { %s1163_s18 = smov [#allocation7]   ;;  %s1085_s23 = scalar_lea.hbm %s1324_s2, 2048 }
  0x25   :  { %s44_s19 = sshll.u32 %s1163_s18, 4  ;;  %p1086_p2 = scmp.ne.s32.totalorder %s1324_s2, %s1085_s23  ;;  %s45_s19 = int_to_ptr.vmem [resolvable:$true] %s44_s19 }
  0x26   :  { %p1089_p3 = scmp.lt.u32.totalorder %s1085_s23, %s1324_s2 }
  0x28   :  { %p1091_p4 = pnand %p1089_p3, %p1086_p2 }
  0x2a   :  { %1094 = shalt.err (!%p1091_p4)
}
  0x2b   :  { %s1095_s28 = scalar_lea.vmem %s45_s19, 2048  ;;  %p1100_p6 = scmp.lt.s32.totalorder %s45_s19, %s45_s19 }
  0x2c   :  { %p1096_p5 = scmp.ne.s32.totalorder %s45_s19, %s1095_s28  ;;  %p1101_p7 = scmp.lt.s32.totalorder %s1095_s28, %s1095_s28 }
  0x2e   :  { %p1102_p8 = por %p1101_p7, %p1100_p6 }
  0x30   :  { %p1103_p9 = pnand %p1102_p8, %p1096_p5 }
  0x32   :  { %1106 = shalt.err (!%p1103_p9)
}
  0x33   :  { %50 = dma.hbm_to_vmem [thread:$0]  %s1324_s2, 2048, %s45_s19, [#allocation6], %s1161_s30, %s1161_s30, %s1162_s6  }
  0x34   :  { %1151 = dma.done.wait [#allocation3], 4096  }
  0x35   :  { %1152 = vsyncadd [#allocation3], 4294963200 }
  0x36   :  { %1153 = dma.done.wait [#allocation6], 4096  }
  0x37   :  { %1154 = vsyncadd [#allocation6], 4294963200  ;;  %v94_v0 = vld [vmem:[#allocation5] sm:$0xff]  ;;  %v95_v1 = vld [vmem:[#allocation5 + $0x8] sm:$0xff]  ;;  %s1165_s8 = smov [#allocation8]  }
  0x38   :  { %v406_v2 = vld [vmem:[#allocation7] sm:$0xff]  ;;  %v970_v3 = vpack.c.bf16 %v95_v1, %v94_v0  ;;  %v407_v4 = vld [vmem:[#allocation7 + $0x8] sm:$0xff]  ;;  %v96_v5 = vld [vmem:[#allocation5 + $0x10] sm:$0xff]  ;;  %s684_s9 = sshll.u32 %s1165_s8, 4  ;;  %s1285_s9 = int_to_ptr.vmem [resolvable:$true] %s684_s9 }
  0x39   :  { %v97_v6 = vld [vmem:[#allocation5 + $0x18] sm:$0xff]  ;;  %v1002_v7 = vpack.c.bf16 %v407_v4, %v406_v2  ;;  %v408_v9 = vld [vmem:[#allocation7 + $0x10] sm:$0xff]  ;;  %v98_v11 = vld [vmem:[#allocation5 + $0x20] sm:$0xff] }
  0x3a   :  { %v974_v8 = vpack.c.bf16 %v97_v6, %v96_v5  ;;  %v409_v10 = vld [vmem:[#allocation7 + $0x18] sm:$0xff]  ;;  %971 = vmatprep.subr.bf16.mxu0 %v970_v3  ;;  %v99_v13 = vld [vmem:[#allocation5 + $0x28] sm:$0xff]  ;;  %v410_v14 = vld [vmem:[#allocation7 + $0x20] sm:$0xff] }
  0x3b   :  { %v1006_v12 = vpack.c.bf16 %v409_v10, %v408_v9  ;;  %v411_v15 = vld [vmem:[#allocation7 + $0x28] sm:$0xff]  ;;  %973 = vmatpush3.bf16.msra.mxu0 %v970_v3  ;;  %1003 = vmatprep.subr.bf16.mxu1 %v1002_v7  ;;  %v978_v16 = vpack.c.bf16 %v99_v13, %v98_v11  ;;  %v100_v18 = vld [vmem:[#allocation5 + $0x30] sm:$0xff]  ;;  %v101_v19 = vld [vmem:[#allocation5 + $0x38] sm:$0xff] }
  0x3c   :  { %1005 = vmatpush3.bf16.msra.mxu1 %v1002_v7  ;;  %975 = vmatprep.subr.bf16.mxu0 %v974_v8  ;;  %v1010_v17 = vpack.c.bf16 %v411_v15, %v410_v14  ;;  %v412_v20 = vld [vmem:[#allocation7 + $0x30] sm:$0xff]  ;;  %v413_v21 = vld [vmem:[#allocation7 + $0x38] sm:$0xff]  ;;  %v982_v22 = vpack.c.bf16 %v101_v19, %v100_v18  ;;  %v102_v24 = vld [vmem:[#allocation5 + $0x40] sm:$0xff] }
  0x3d   :  { %1007 = vmatprep.subr.bf16.mxu1 %v1006_v12  ;;  %v1014_v23 = vpack.c.bf16 %v413_v21, %v412_v20  ;;  %v103_v25 = vld [vmem:[#allocation5 + $0x48] sm:$0xff]  ;;  %v62_v26 = vld [vmem:[#allocation2] sm:$0xff]  ;;  %v104_v31 = vld [vmem:[#allocation5 + $0x50] sm:$0xff] }
  0x3e   :  { %v414_v27 = vld [vmem:[#allocation7 + $0x40] sm:$0xff]  ;;  %v415_v28 = vld [vmem:[#allocation7 + $0x48] sm:$0xff]  ;;  %842 = vmatprep.mubr.f32.mxu0 %v62_v26  ;;  %922 = vmatprep.mubr.f32.mxu1 %v62_v26  ;;  %v986_v29 = vpack.c.bf16 %v103_v25, %v102_v24  ;;  %v105_v32 = vld [vmem:[#allocation5 + $0x58] sm:$0xff] }
  0x3f   :  { %977 = vmatpush3.bf16.msra.mxu0 %v974_v8  ;;  %v1018_v30 = vpack.c.bf16 %v415_v28, %v414_v27  ;;  %v416_v33 = vld [vmem:[#allocation7 + $0x50] sm:$0xff]  ;;  %v417_v34 = vld [vmem:[#allocation7 + $0x58] sm:$0xff]  ;;  %v990_v35 = vpack.c.bf16 %v105_v32, %v104_v31  ;;  %v106_v37 = vld [vmem:[#allocation5 + $0x60] sm:$0xff] }
  0x40   :  { %1009 = vmatpush3.bf16.msra.mxu1 %v1006_v12  ;;  %979 = vmatprep.subr.bf16.mxu0 %v978_v16  ;;  %v1022_v36 = vpack.c.bf16 %v417_v34, %v416_v33  ;;  %v107_v38 = vld [vmem:[#allocation5 + $0x68] sm:$0xff]  ;;  %v418_v39 = vld [vmem:[#allocation7 + $0x60] sm:$0xff]  ;;  %v108_v43 = vld [vmem:[#allocation5 + $0x70] sm:$0xff] }
  0x41   :  { %1011 = vmatprep.subr.bf16.mxu1 %v1010_v17  ;;  %v419_v40 = vld [vmem:[#allocation7 + $0x68] sm:$0xff]  ;;  %v994_v41 = vpack.c.bf16 %v107_v38, %v106_v37  ;;  %v109_v44 = vld [vmem:[#allocation5 + $0x78] sm:$0xff]  ;;  %v420_v45 = vld [vmem:[#allocation7 + $0x70] sm:$0xff] }
  0x42   :  { %v1026_v42 = vpack.c.bf16 %v419_v40, %v418_v39  ;;  %v421_v46 = vld [vmem:[#allocation7 + $0x78] sm:$0xff]  ;;  %v998_v47 = vpack.c.bf16 %v109_v44, %v108_v43  ;;  %v63_v49 = vld [vmem:[#allocation2 + $0x8] sm:$0xff]  ;;  %v64_v50 = vld [vmem:[#allocation2 + $0x10] sm:$0xff] }
  0x43   :  { %981 = vmatpush3.bf16.msra.mxu0 %v978_v16  ;;  %v1030_v48 = vpack.c.bf16 %v421_v46, %v420_v45  ;;  %v65_v51 = vld [vmem:[#allocation2 + $0x18] sm:$0xff]  ;;  %v66_v52 = vld [vmem:[#allocation2 + $0x20] sm:$0xff]  ;;  %v67_v53 = vld [vmem:[#allocation2 + $0x28] sm:$0xff] }
  0x44   :  { %1013 = vmatpush3.bf16.msra.mxu1 %v1010_v17  ;;  %983 = vmatprep.subr.bf16.mxu0 %v982_v22  ;;  %v68_v54 = vld [vmem:[#allocation2 + $0x30] sm:$0xff]  ;;  %v69_v55 = vld [vmem:[#allocation2 + $0x38] sm:$0xff]  ;;  %v70_v56 = vld [vmem:[#allocation2 + $0x40] sm:$0xff] }
  0x45   :  { %1015 = vmatprep.subr.bf16.mxu1 %v1014_v23  ;;  %v71_v57 = vld [vmem:[#allocation2 + $0x48] sm:$0xff]  ;;  %v72_v58 = vld [vmem:[#allocation2 + $0x50] sm:$0xff]  ;;  %v73_v59 = vld [vmem:[#allocation2 + $0x58] sm:$0xff] }
  0x46   :  { %v74_v60 = vld [vmem:[#allocation2 + $0x60] sm:$0xff]  ;;  %v75_v61 = vld [vmem:[#allocation2 + $0x68] sm:$0xff]  ;;  %v76_v62 = vld [vmem:[#allocation2 + $0x70] sm:$0xff] }
  0x47   :  { %985 = vmatpush3.bf16.msra.mxu0 %v982_v22  ;;  %v77_v63 = vld [vmem:[#allocation2 + $0x78] sm:$0xff]  ;;  %v78_v0 = vld [vmem:[#allocation2 + $0x80] sm:$0xff]  ;;  %v79_v1 = vld [vmem:[#allocation2 + $0x88] sm:$0xff] }
  0x48   :  { %1017 = vmatpush3.bf16.msra.mxu1 %v1014_v23  ;;  %987 = vmatprep.subr.bf16.mxu0 %v986_v29  ;;  %v80_v2 = vld [vmem:[#allocation2 + $0x90] sm:$0xff]  ;;  %v81_v3 = vld [vmem:[#allocation2 + $0x98] sm:$0xff]  ;;  %v82_v4 = vld [vmem:[#allocation2 + $0xa0] sm:$0xff] }
  0x49   :  { %1019 = vmatprep.subr.bf16.mxu1 %v1018_v30  ;;  %v83_v5 = vld [vmem:[#allocation2 + $0xa8] sm:$0xff]  ;;  %v84_v6 = vld [vmem:[#allocation2 + $0xb0] sm:$0xff]  ;;  %v85_v7 = vld [vmem:[#allocation2 + $0xb8] sm:$0xff] }
  0x4a   :  { %v86_v8 = vld [vmem:[#allocation2 + $0xc0] sm:$0xff]  ;;  %v87_v9 = vld [vmem:[#allocation2 + $0xc8] sm:$0xff]  ;;  %v88_v10 = vld [vmem:[#allocation2 + $0xd0] sm:$0xff] }
  0x4b   :  { %989 = vmatpush3.bf16.msra.mxu0 %v986_v29  ;;  %v89_v11 = vld [vmem:[#allocation2 + $0xd8] sm:$0xff]  ;;  %v90_v12 = vld [vmem:[#allocation2 + $0xe0] sm:$0xff]  ;;  %v91_v13 = vld [vmem:[#allocation2 + $0xe8] sm:$0xff] }
  0x4c   :  { %1021 = vmatpush3.bf16.msra.mxu1 %v1018_v30  ;;  %991 = vmatprep.subr.bf16.mxu0 %v990_v35  ;;  %v92_v14 = vld [vmem:[#allocation2 + $0xf0] sm:$0xff]  ;;  %v93_v15 = vld [vmem:[#allocation2 + $0xf8] sm:$0xff]  ;;  %v1251_v16 = vld [vmem:[%s1325_s3] ss:$0 sm:$0xff]  ;;  %s1164_s3 = smov [#allocation9]  }
  0x4d   :  { %1023 = vmatprep.subr.bf16.mxu1 %v1022_v36  ;;  %s696_s7 = sshll.u32 %s1164_s3, 4  ;;  %s697_s7 = int_to_ptr.vmem [resolvable:$true] %s696_s7 }
  0x4e   :  { %s1107_s10 = scalar_lea.vmem %s697_s7, 4096  ;;  %p1112_p11 = scmp.lt.s32.totalorder %s697_s7, %s697_s7 }
  0x4f   :  { %993 = vmatpush3.bf16.msra.mxu0 %v990_v35  ;;  %p1108_p10 = scmp.ne.s32.totalorder %s697_s7, %s1107_s10  ;;  %p1113_p12 = scmp.lt.s32.totalorder %s1107_s10, %s1107_s10 }
  0x50   :  { %1025 = vmatpush3.bf16.msra.mxu1 %v1022_v36  ;;  %995 = vmatprep.subr.bf16.mxu0 %v994_v41 }
  0x51   :  { %1027 = vmatprep.subr.bf16.mxu1 %v1026_v42  ;;  %p1114_p13 = por %p1113_p12, %p1112_p11 }
  0x53   :  { %997 = vmatpush3.bf16.msra.mxu0 %v994_v41  ;;  %p1115_p0 = pnand %p1114_p13, %p1108_p10 }
  0x54   :  { %1029 = vmatpush3.bf16.msra.mxu1 %v1026_v42  ;;  %999 = vmatprep.subr.bf16.mxu0 %v998_v47 }
  0x55   :  { %1031 = vmatprep.subr.bf16.mxu1 %v1030_v48 }
  0x57   :  { %1001 = vmatpush3.bf16.msra.mxu0 %v998_v47 }
  0x58   :  { %1033 = vmatpush3.bf16.msra.mxu1 %v1030_v48 }
  0x5a   :  { %843 = vmatmul.mubr.f32.vlgmr.msra.gmra.mrb[0].mxu0 %v63_v49 }
  0x5b   :  { %923 = vmatmul.mubr.f32.vlgmr.msra.gmra.mrb[0].mxu1 %v63_v49  ;;  %845 = vmatprep.mubr.f32.mxu0 %v64_v50 }
  0x5c   :  { %925 = vmatprep.mubr.f32.mxu1 %v64_v50 }
  0x5e   :  { %846 = vmatmul.mubr.f32.gmra.mrb[2].mxu0 %v65_v51 }
  0x5f   :  { %926 = vmatmul.mubr.f32.gmra.mrb[2].mxu1 %v65_v51  ;;  %848 = vmatprep.mubr.f32.mxu0 %v66_v52 }
  0x60   :  { %928 = vmatprep.mubr.f32.mxu1 %v66_v52 }
  0x62   :  { %849 = vmatmul.mubr.f32.gmra.mrb[4].mxu0 %v67_v53 }
  0x63   :  { %929 = vmatmul.mubr.f32.gmra.mrb[4].mxu1 %v67_v53  ;;  %851 = vmatprep.mubr.f32.mxu0 %v68_v54 }
  0x64   :  { %931 = vmatprep.mubr.f32.mxu1 %v68_v54 }
  0x66   :  { %852 = vmatmul.mubr.f32.gmra.mrb[6].mxu0 %v69_v55 }
  0x67   :  { %932 = vmatmul.mubr.f32.gmra.mrb[6].mxu1 %v69_v55  ;;  %854 = vmatprep.mubr.f32.mxu0 %v70_v56 }
  0x68   :  { %934 = vmatprep.mubr.f32.mxu1 %v70_v56 }
  0x6a   :  { %855 = vmatmul.mubr.f32.gmra.mrb[8].mxu0 %v71_v57 }
  0x6b   :  { %935 = vmatmul.mubr.f32.gmra.mrb[8].mxu1 %v71_v57  ;;  %857 = vmatprep.mubr.f32.mxu0 %v72_v58 }
  0x6c   :  { %937 = vmatprep.mubr.f32.mxu1 %v72_v58 }
  0x6e   :  { %858 = vmatmul.mubr.f32.gmra.mrb[10].mxu0 %v73_v59 }
  0x6f   :  { %938 = vmatmul.mubr.f32.gmra.mrb[10].mxu1 %v73_v59  ;;  %860 = vmatprep.mubr.f32.mxu0 %v74_v60 }
  0x70   :  { %940 = vmatprep.mubr.f32.mxu1 %v74_v60 }
  0x72   :  { %861 = vmatmul.mubr.f32.gmra.mrb[12].mxu0 %v75_v61 }
  0x73   :  { %941 = vmatmul.mubr.f32.gmra.mrb[12].mxu1 %v75_v61  ;;  %863 = vmatprep.mubr.f32.mxu0 %v76_v62 }
  0x74   :  { %943 = vmatprep.mubr.f32.mxu1 %v76_v62 }
  0x76   :  { %864 = vmatmul.mubr.f32.gmra.mrb[14].mxu0 %v77_v63 }
  0x77   :  { %944 = vmatmul.mubr.f32.gmra.mrb[14].mxu1 %v77_v63  ;;  %866 = vmatprep.mubr.f32.mxu0 %v78_v0 }
  0x78   :  { %946 = vmatprep.mubr.f32.mxu1 %v78_v0 }
  0x7a   :  { %867 = vmatmul.mubr.f32.gmra.mrb[16].mxu0 %v79_v1 }
  0x7b   :  { %947 = vmatmul.mubr.f32.gmra.mrb[16].mxu1 %v79_v1  ;;  %869 = vmatprep.mubr.f32.mxu0 %v80_v2 }
  0x7c   :  { %949 = vmatprep.mubr.f32.mxu1 %v80_v2 }
  0x7e   :  { %870 = vmatmul.mubr.f32.gmra.mrb[18].mxu0 %v81_v3 }
  0x7f   :  { %950 = vmatmul.mubr.f32.gmra.mrb[18].mxu1 %v81_v3  ;;  %872 = vmatprep.mubr.f32.mxu0 %v82_v4 }
  0x80   :  { %952 = vmatprep.mubr.f32.mxu1 %v82_v4 }
  0x82   :  { %873 = vmatmul.mubr.f32.gmra.mrb[20].mxu0 %v83_v5 }
  0x83   :  { %953 = vmatmul.mubr.f32.gmra.mrb[20].mxu1 %v83_v5  ;;  %875 = vmatprep.mubr.f32.mxu0 %v84_v6 }
  0x84   :  { %955 = vmatprep.mubr.f32.mxu1 %v84_v6 }
  0x86   :  { %876 = vmatmul.mubr.f32.gmra.mrb[22].mxu0 %v85_v7 }
  0x87   :  { %956 = vmatmul.mubr.f32.gmra.mrb[22].mxu1 %v85_v7  ;;  %878 = vmatprep.mubr.f32.mxu0 %v86_v8 }
  0x88   :  { %958 = vmatprep.mubr.f32.mxu1 %v86_v8 }
  0x8a   :  { %879 = vmatmul.mubr.f32.gmra.mrb[24].mxu0 %v87_v9 }
  0x8b   :  { %959 = vmatmul.mubr.f32.gmra.mrb[24].mxu1 %v87_v9  ;;  %881 = vmatprep.mubr.f32.mxu0 %v88_v10 }
  0x8c   :  { %961 = vmatprep.mubr.f32.mxu1 %v88_v10 }
  0x8e   :  { %882 = vmatmul.mubr.f32.gmra.mrb[26].mxu0 %v89_v11 }
  0x8f   :  { %962 = vmatmul.mubr.f32.gmra.mrb[26].mxu1 %v89_v11  ;;  %884 = vmatprep.mubr.f32.mxu0 %v90_v12 }
  0x90   :  { %964 = vmatprep.mubr.f32.mxu1 %v90_v12 }
  0x92   :  { %885 = vmatmul.mubr.f32.gmra.mrb[28].mxu0 %v91_v13 }
  0x93   :  { %965 = vmatmul.mubr.f32.gmra.mrb[28].mxu1 %v91_v13  ;;  %887 = vmatprep.mubr.f32.mxu0 %v92_v14 }
  0x94   :  { %967 = vmatprep.mubr.f32.mxu1 %v92_v14 }
  0x96   :  { %888 = vmatmul.mubr.f32.gmra.mrb[30].mxu0 %v93_v15 }
  0x97   :  { %968 = vmatmul.mubr.f32.gmra.mrb[30].mxu1 %v93_v15 }
 0x12d   :  { %v844_v17 = vpop.f32.mrb[0].mxu0 }
 0x12e   :  { %v189_v18 = vadd.f32 %v844_v17, %v1251_v16  ;;  %v183_v19 = vpop.f32.mrb[1].mxu0  ;;  %v924_v20 = vpop.f32.mrb[0].mxu1 }
 0x12f   :  { %v184_v21 = vadd.f32 %v1251_v16, %v183_v19  ;;  %648 = vst [vmem:[#allocation9 + $0x8] sm:$0xff] %v924_v20  ;;  %v488_v22 = vpop.f32.mrb[1].mxu1 }
 0x130   :  { %343 = vst [vmem:[#allocation8 + $0x8] sm:$0xff] %v189_v18  ;;  %647 = vst [vmem:[#allocation9] sm:$0xff] %v488_v22 }
 0x131   :  { %342 = vst [vmem:[#allocation8] sm:$0xff] %v184_v21  ;;  %v847_v23 = vpop.f32.mrb[2].mxu0 }
 0x132   :  { %v199_v24 = vadd.f32 %v847_v23, %v1251_v16  ;;  %v193_v25 = vpop.f32.mrb[3].mxu0  ;;  %v927_v26 = vpop.f32.mrb[2].mxu1 }
 0x133   :  { %v194_v27 = vadd.f32 %v1251_v16, %v193_v25  ;;  %650 = vst [vmem:[#allocation9 + $0x18] sm:$0xff] %v927_v26  ;;  %v498_v28 = vpop.f32.mrb[3].mxu1 }
 0x134   :  { %345 = vst [vmem:[#allocation8 + $0x18] sm:$0xff] %v199_v24  ;;  %649 = vst [vmem:[#allocation9 + $0x10] sm:$0xff] %v498_v28 }
 0x135   :  { %344 = vst [vmem:[#allocation8 + $0x10] sm:$0xff] %v194_v27  ;;  %v850_v29 = vpop.f32.mrb[4].mxu0 }
 0x136   :  { %v209_v30 = vadd.f32 %v850_v29, %v1251_v16  ;;  %v203_v31 = vpop.f32.mrb[5].mxu0  ;;  %v930_v32 = vpop.f32.mrb[4].mxu1 }
 0x137   :  { %v204_v33 = vadd.f32 %v1251_v16, %v203_v31  ;;  %652 = vst [vmem:[#allocation9 + $0x28] sm:$0xff] %v930_v32  ;;  %v508_v34 = vpop.f32.mrb[5].mxu1 }
 0x138   :  { %347 = vst [vmem:[#allocation8 + $0x28] sm:$0xff] %v209_v30  ;;  %651 = vst [vmem:[#allocation9 + $0x20] sm:$0xff] %v508_v34 }
 0x139   :  { %346 = vst [vmem:[#allocation8 + $0x20] sm:$0xff] %v204_v33  ;;  %v853_v35 = vpop.f32.mrb[6].mxu0 }
 0x13a   :  { %v219_v36 = vadd.f32 %v853_v35, %v1251_v16  ;;  %v213_v37 = vpop.f32.mrb[7].mxu0  ;;  %v933_v38 = vpop.f32.mrb[6].mxu1 }
 0x13b   :  { %v214_v39 = vadd.f32 %v1251_v16, %v213_v37  ;;  %654 = vst [vmem:[#allocation9 + $0x38] sm:$0xff] %v933_v38  ;;  %v518_v40 = vpop.f32.mrb[7].mxu1 }
 0x13c   :  { %349 = vst [vmem:[#allocation8 + $0x38] sm:$0xff] %v219_v36  ;;  %653 = vst [vmem:[#allocation9 + $0x30] sm:$0xff] %v518_v40 }
 0x13d   :  { %348 = vst [vmem:[#allocation8 + $0x30] sm:$0xff] %v214_v39  ;;  %v856_v41 = vpop.f32.mrb[8].mxu0 }
 0x13e   :  { %v229_v42 = vadd.f32 %v856_v41, %v1251_v16  ;;  %v223_v43 = vpop.f32.mrb[9].mxu0  ;;  %v936_v44 = vpop.f32.mrb[8].mxu1 }
 0x13f   :  { %v224_v45 = vadd.f32 %v1251_v16, %v223_v43  ;;  %656 = vst [vmem:[#allocation9 + $0x48] sm:$0xff] %v936_v44  ;;  %v528_v46 = vpop.f32.mrb[9].mxu1 }
 0x140   :  { %351 = vst [vmem:[#allocation8 + $0x48] sm:$0xff] %v229_v42  ;;  %655 = vst [vmem:[#allocation9 + $0x40] sm:$0xff] %v528_v46 }
 0x141   :  { %350 = vst [vmem:[#allocation8 + $0x40] sm:$0xff] %v224_v45  ;;  %v859_v47 = vpop.f32.mrb[10].mxu0 }
 0x142   :  { %v239_v48 = vadd.f32 %v859_v47, %v1251_v16  ;;  %v233_v49 = vpop.f32.mrb[11].mxu0  ;;  %v939_v50 = vpop.f32.mrb[10].mxu1 }
 0x143   :  { %v234_v51 = vadd.f32 %v1251_v16, %v233_v49  ;;  %658 = vst [vmem:[#allocation9 + $0x58] sm:$0xff] %v939_v50  ;;  %v538_v52 = vpop.f32.mrb[11].mxu1 }
 0x144   :  { %353 = vst [vmem:[#allocation8 + $0x58] sm:$0xff] %v239_v48  ;;  %657 = vst [vmem:[#allocation9 + $0x50] sm:$0xff] %v538_v52 }
 0x145   :  { %352 = vst [vmem:[#allocation8 + $0x50] sm:$0xff] %v234_v51  ;;  %v862_v53 = vpop.f32.mrb[12].mxu0 }
 0x146   :  { %v249_v54 = vadd.f32 %v862_v53, %v1251_v16  ;;  %v243_v55 = vpop.f32.mrb[13].mxu0  ;;  %v942_v56 = vpop.f32.mrb[12].mxu1 }
 0x147   :  { %v244_v57 = vadd.f32 %v1251_v16, %v243_v55  ;;  %660 = vst [vmem:[#allocation9 + $0x68] sm:$0xff] %v942_v56  ;;  %v548_v58 = vpop.f32.mrb[13].mxu1 }
 0x148   :  { %355 = vst [vmem:[#allocation8 + $0x68] sm:$0xff] %v249_v54  ;;  %659 = vst [vmem:[#allocation9 + $0x60] sm:$0xff] %v548_v58 }
 0x149   :  { %354 = vst [vmem:[#allocation8 + $0x60] sm:$0xff] %v244_v57  ;;  %v865_v59 = vpop.f32.mrb[14].mxu0 }
 0x14a   :  { %v259_v60 = vadd.f32 %v865_v59, %v1251_v16  ;;  %v253_v61 = vpop.f32.mrb[15].mxu0  ;;  %v945_v62 = vpop.f32.mrb[14].mxu1 }
 0x14b   :  { %v254_v63 = vadd.f32 %v1251_v16, %v253_v61  ;;  %662 = vst [vmem:[#allocation9 + $0x78] sm:$0xff] %v945_v62  ;;  %v558_v0 = vpop.f32.mrb[15].mxu1 }
 0x14c   :  { %357 = vst [vmem:[#allocation8 + $0x78] sm:$0xff] %v259_v60  ;;  %661 = vst [vmem:[#allocation9 + $0x70] sm:$0xff] %v558_v0 }
 0x14d   :  { %356 = vst [vmem:[#allocation8 + $0x70] sm:$0xff] %v254_v63  ;;  %v868_v1 = vpop.f32.mrb[16].mxu0 }
 0x14e   :  { %v269_v2 = vadd.f32 %v868_v1, %v1251_v16  ;;  %v263_v3 = vpop.f32.mrb[17].mxu0  ;;  %v948_v4 = vpop.f32.mrb[16].mxu1 }
 0x14f   :  { %v264_v5 = vadd.f32 %v1251_v16, %v263_v3  ;;  %664 = vst [vmem:[#allocation9 + $0x88] sm:$0xff] %v948_v4  ;;  %v568_v6 = vpop.f32.mrb[17].mxu1 }
 0x150   :  { %359 = vst [vmem:[#allocation8 + $0x88] sm:$0xff] %v269_v2  ;;  %663 = vst [vmem:[#allocation9 + $0x80] sm:$0xff] %v568_v6 }
 0x151   :  { %358 = vst [vmem:[#allocation8 + $0x80] sm:$0xff] %v264_v5  ;;  %v871_v7 = vpop.f32.mrb[18].mxu0 }
 0x152   :  { %v279_v8 = vadd.f32 %v871_v7, %v1251_v16  ;;  %v273_v9 = vpop.f32.mrb[19].mxu0  ;;  %v951_v10 = vpop.f32.mrb[18].mxu1 }
 0x153   :  { %v274_v11 = vadd.f32 %v1251_v16, %v273_v9  ;;  %666 = vst [vmem:[#allocation9 + $0x98] sm:$0xff] %v951_v10  ;;  %v578_v12 = vpop.f32.mrb[19].mxu1 }
 0x154   :  { %361 = vst [vmem:[#allocation8 + $0x98] sm:$0xff] %v279_v8  ;;  %665 = vst [vmem:[#allocation9 + $0x90] sm:$0xff] %v578_v12 }
 0x155   :  { %360 = vst [vmem:[#allocation8 + $0x90] sm:$0xff] %v274_v11  ;;  %v874_v13 = vpop.f32.mrb[20].mxu0 }
 0x156   :  { %v289_v14 = vadd.f32 %v874_v13, %v1251_v16  ;;  %v283_v15 = vpop.f32.mrb[21].mxu0  ;;  %v954_v17 = vpop.f32.mrb[20].mxu1 }
 0x157   :  { %v284_v18 = vadd.f32 %v1251_v16, %v283_v15  ;;  %668 = vst [vmem:[#allocation9 + $0xa8] sm:$0xff] %v954_v17  ;;  %v588_v19 = vpop.f32.mrb[21].mxu1 }
 0x158   :  { %363 = vst [vmem:[#allocation8 + $0xa8] sm:$0xff] %v289_v14  ;;  %667 = vst [vmem:[#allocation9 + $0xa0] sm:$0xff] %v588_v19 }
 0x159   :  { %362 = vst [vmem:[#allocation8 + $0xa0] sm:$0xff] %v284_v18  ;;  %v877_v20 = vpop.f32.mrb[22].mxu0 }
 0x15a   :  { %v299_v21 = vadd.f32 %v877_v20, %v1251_v16  ;;  %v293_v22 = vpop.f32.mrb[23].mxu0  ;;  %v957_v23 = vpop.f32.mrb[22].mxu1 }
 0x15b   :  { %v294_v24 = vadd.f32 %v1251_v16, %v293_v22  ;;  %670 = vst [vmem:[#allocation9 + $0xb8] sm:$0xff] %v957_v23  ;;  %v598_v25 = vpop.f32.mrb[23].mxu1 }
 0x15c   :  { %365 = vst [vmem:[#allocation8 + $0xb8] sm:$0xff] %v299_v21  ;;  %669 = vst [vmem:[#allocation9 + $0xb0] sm:$0xff] %v598_v25 }
 0x15d   :  { %364 = vst [vmem:[#allocation8 + $0xb0] sm:$0xff] %v294_v24  ;;  %v880_v26 = vpop.f32.mrb[24].mxu0 }
 0x15e   :  { %v309_v27 = vadd.f32 %v880_v26, %v1251_v16  ;;  %v303_v28 = vpop.f32.mrb[25].mxu0  ;;  %v960_v29 = vpop.f32.mrb[24].mxu1 }
 0x15f   :  { %v304_v30 = vadd.f32 %v1251_v16, %v303_v28  ;;  %672 = vst [vmem:[#allocation9 + $0xc8] sm:$0xff] %v960_v29  ;;  %v608_v31 = vpop.f32.mrb[25].mxu1 }
 0x160   :  { %367 = vst [vmem:[#allocation8 + $0xc8] sm:$0xff] %v309_v27  ;;  %671 = vst [vmem:[#allocation9 + $0xc0] sm:$0xff] %v608_v31 }
 0x161   :  { %366 = vst [vmem:[#allocation8 + $0xc0] sm:$0xff] %v304_v30  ;;  %v883_v32 = vpop.f32.mrb[26].mxu0 }
 0x162   :  { %v319_v33 = vadd.f32 %v883_v32, %v1251_v16  ;;  %v313_v34 = vpop.f32.mrb[27].mxu0  ;;  %v963_v35 = vpop.f32.mrb[26].mxu1 }
 0x163   :  { %v314_v36 = vadd.f32 %v1251_v16, %v313_v34  ;;  %674 = vst [vmem:[#allocation9 + $0xd8] sm:$0xff] %v963_v35  ;;  %v618_v37 = vpop.f32.mrb[27].mxu1 }
 0x164   :  { %369 = vst [vmem:[#allocation8 + $0xd8] sm:$0xff] %v319_v33  ;;  %673 = vst [vmem:[#allocation9 + $0xd0] sm:$0xff] %v618_v37 }
 0x165   :  { %368 = vst [vmem:[#allocation8 + $0xd0] sm:$0xff] %v314_v36  ;;  %v886_v38 = vpop.f32.mrb[28].mxu0 }
 0x166   :  { %v329_v39 = vadd.f32 %v886_v38, %v1251_v16  ;;  %v323_v40 = vpop.f32.mrb[29].mxu0  ;;  %v966_v41 = vpop.f32.mrb[28].mxu1 }
 0x167   :  { %v324_v42 = vadd.f32 %v1251_v16, %v323_v40  ;;  %676 = vst [vmem:[#allocation9 + $0xe8] sm:$0xff] %v966_v41  ;;  %v628_v43 = vpop.f32.mrb[29].mxu1 }
 0x168   :  { %371 = vst [vmem:[#allocation8 + $0xe8] sm:$0xff] %v329_v39  ;;  %675 = vst [vmem:[#allocation9 + $0xe0] sm:$0xff] %v628_v43 }
 0x169   :  { %370 = vst [vmem:[#allocation8 + $0xe0] sm:$0xff] %v324_v42  ;;  %v889_v44 = vpop.f32.mrb[30].mxu0 }
 0x16a   :  { %v339_v45 = vadd.f32 %v889_v44, %v1251_v16  ;;  %v333_v46 = vpop.f32.mrb[31].mxu0  ;;  %v969_v47 = vpop.f32.mrb[30].mxu1 }
 0x16b   :  { %v334_v48 = vadd.f32 %v1251_v16, %v333_v46  ;;  %678 = vst [vmem:[#allocation9 + $0xf8] sm:$0xff] %v969_v47  ;;  %v638_v49 = vpop.f32.mrb[31].mxu1 }
 0x16c   :  { %373 = vst [vmem:[#allocation8 + $0xf8] sm:$0xff] %v339_v45  ;;  %677 = vst [vmem:[#allocation9 + $0xf0] sm:$0xff] %v638_v49 }
 0x16d   :  { %372 = vst [vmem:[#allocation8 + $0xf0] sm:$0xff] %v334_v48 }
 0x16e   :  { %1118 = shalt.err (!%p1115_p0)
}
 0x16f   :  { %s1119_s13 = scalar_lea.hbm %s1327_s5, 4096 }
 0x170   :  { %p1120_p1 = scmp.ne.s32.totalorder %s1327_s5, %s1119_s13  ;;  %p1123_p2 = scmp.lt.u32.totalorder %s1119_s13, %s1327_s5 }
 0x172   :  { %p1125_p3 = pnand %p1123_p2, %p1120_p1 }
 0x174   :  { %1128 = shalt.err (!%p1125_p3)
}
 0x175   :  { %702 = dma.vmem_to_hbm [thread:$0]  %s697_s7, 4096, %s1327_s5, [#allocation10], %s1161_s30, %s1161_s30, %s1162_s6  }
 0x176   :  { %s1129_s19 = scalar_lea.vmem %s1285_s9, 4096  ;;  %p1134_p5 = scmp.lt.s32.totalorder %s1285_s9, %s1285_s9 }
 0x177   :  { %p1130_p4 = scmp.ne.s32.totalorder %s1285_s9, %s1129_s19  ;;  %p1135_p6 = scmp.lt.s32.totalorder %s1129_s19, %s1129_s19 }
 0x179   :  { %p1136_p7 = por %p1135_p6, %p1134_p5 }
 0x17b   :  { %p1137_p8 = pnand %p1136_p7, %p1130_p4 }
 0x17d   :  { %1140 = shalt.err (!%p1137_p8)
}
 0x17e   :  { %s1141_s23 = scalar_lea.hbm %s1326_s4, 4096 }
 0x17f   :  { %p1142_p9 = scmp.ne.s32.totalorder %s1326_s4, %s1141_s23  ;;  %p1145_p10 = scmp.lt.u32.totalorder %s1141_s23, %s1326_s4 }
 0x181   :  { %p1147_p11 = pnand %p1145_p10, %p1142_p9 }
 0x183   :  { %1150 = shalt.err (!%p1147_p11)
}
 0x184   :  { %690 = dma.vmem_to_hbm [thread:$0]  %s1285_s9, 4096, %s1326_s4, [#allocation4], %s1161_s30, %s1161_s30, %s1162_s6  }
 0x185   :  { %1155 = dma.done.wait [#allocation4], 4096  }
 0x186   :  { %1156 = vsyncadd [#allocation4], 4294963200 }
 0x187   :  { %1157 = dma.done.wait [#allocation10], 4096  }
 0x188   :  { %1158 = vsyncadd [#allocation10], 4294963200 }
 0x189   :  { %709 = vsyncpa [#allocation3], 1 }
 0x18a   :  { %710 = vsyncpa [#allocation6], 1 }
 0x18b   :  { %711 = vsyncpa [#allocation4], 1 }
 0x18c   :  { %712 = vsyncpa [#allocation10], 1 }

</bundles_post_ra>
